<compile_context>
chip_gen: v5e
topology: v5e:2x2
jax: 0.10.0
libtpu: 0.0.40
codegen_flags: <defaults>
</compile_context>

<pallas_src>
import functools
import math

import jax
import jax.numpy as jnp
from jax import lax
from jax.experimental import pallas as pl
from jax.experimental.pallas import tpu as pltpu


_MASK_VALUE = -1e30  # large-negative (not -inf) so masked columns never make NaNs


def _mha_fwd_kernel(q_ref, k_ref, v_ref, o_ref, m_sc, l_sc, acc_sc,
                    *, scale, kv_len, block_k, mask_kv_tail):
    # q_ref: (G, tq, E)  k_ref: (G, tk, E)  v_ref: (G, tk, D)  o_ref: (G, tq, D)
    kv_idx = pl.program_id(2)
    last_kv = pl.num_programs(2) - 1

    @pl.when(kv_idx == 0)
    def _init():
        m_sc[...] = jnp.full(m_sc.shape, -jnp.inf, dtype=jnp.float32)
        l_sc[...] = jnp.zeros(l_sc.shape, dtype=jnp.float32)
        acc_sc[...] = jnp.zeros(acc_sc.shape, dtype=jnp.float32)

    # Fold the softmax scale into Q (tq*E mults instead of tq*tk).
    q = q_ref[...] * scale          # (G, tq, E), input dtype (bf16 or f32)
    k = k_ref[...]                  # (G, tk, E)
    v = v_ref[...]                  # (G, tk, D)

    # scores tile: (G, tq, tk); contract the feature dim directly (no k.T),
    # batch over the G heads, accumulate in f32 on the MXU.
    s = lax.dot_general(
        q, k,
        dimension_numbers=(((2,), (2,)), ((0,), (0,))),
        preferred_element_type=jnp.float32)

    if mask_kv_tail:
        # Padding only ever lives in the last kv tile; gate the iota/compare/
        # select so full tiles pay nothing (trace-time `if` + runtime cond).
        def _apply_mask(s_in):
            col = lax.broadcasted_iota(jnp.int32, s_in.shape, dimension=2)
            limit = kv_len - kv_idx * block_k
            return jnp.where(col < limit, s_in, _MASK_VALUE)

        s = lax.cond(kv_idx == last_kv, _apply_mask, lambda x: x, s)

    m_prev = m_sc[...]                                       # (G, tq, 1)
    m_new = jnp.maximum(m_prev, jnp.max(s, axis=-1, keepdims=True))
    alpha = jnp.exp(m_prev - m_new)                          # 0.0 on first step
    p = jnp.exp(s - m_new)                                   # (G, tq, tk), f32

    l_sc[...] = alpha * l_sc[...] + jnp.sum(p, axis=-1, keepdims=True)
    acc_sc[...] = alpha * acc_sc[...] + lax.dot_general(
        p.astype(v.dtype), v,
        dimension_numbers=(((2,), (1,)), ((0,), (0,))),
        preferred_element_type=jnp.float32)
    m_sc[...] = m_new

    @pl.when(kv_idx == last_kv)
    def _finalize():
        inv_l = pl.reciprocal(l_sc[...], approx=True)        # EUP, not VPU divide
        o_ref[...] = (acc_sc[...] * inv_l).astype(o_ref.dtype)


def _round_up(x, m):
    return (x + m - 1) // m * m


def _choose_tile(seq_len, block, mxu_align=128, min_align=8):
    """MXU-native (128-multiple) tiles for real sequences; 8-aligned for tiny ones."""
    if seq_len >= mxu_align:
        return min(block, _round_up(seq_len, mxu_align))
    return _round_up(seq_len, min_align)


def _pick_block_h(num_heads, max_h=8):
    """Largest divisor of num_heads that is <= max_h (heads per grid step)."""
    g = 1
    for cand in range(1, min(num_heads, max_h) + 1):
        if num_heads % cand == 0:
            g = cand
    return g


def multi_heads_attention(queries, keys, values, *, scale=None,
                          block_q=512, block_k=512, block_h=None,
                          cast_to_bf16=True, returnA=False):
    """Forward pass of MultiHeadsAttention (inference; dropout = identity).

    Returns (V, None) with V of shape [B, L, H, D], matching the PyTorch module.
    """
    B, L, H, E = queries.shape
    _, S, _, D = values.shape
    assert keys.shape == (B, S, H, E)

    out_dtype = queries.dtype
    scale_val = float(scale) if scale is not None else 1.0 / math.sqrt(E)

    # Head-major layout: fold (B, H) into one axis, feature dim lane-dense last.
    # TODO(synk): avoid these HBM copies by accepting head-major inputs upstream.
    q = jnp.transpose(queries, (0, 2, 1, 3)).reshape(B * H, L, E)
    k = jnp.transpose(keys, (0, 2, 1, 3)).reshape(B * H, S, E)
    v = jnp.transpose(values, (0, 2, 1, 3)).reshape(B * H, S, D)

    if cast_to_bf16 and q.dtype == jnp.float32:
        # bf16-native MXU rate + half the K/V HBM bytes; f32 accumulation and
        # f32 m/l/acc scratch keep the softmax stable.
        q = q.astype(jnp.bfloat16)
        k = k.astype(jnp.bfloat16)
        v = v.astype(jnp.bfloat16)

    tq = _choose_tile(L, block_q)
    tk = _choose_tile(S, block_k)
    Lp = _round_up(L, tq)
    Sp = _round_up(S, tk)
    if Lp != L:
        q = jnp.pad(q, ((0, 0), (0, Lp - L), (0, 0)))
    if Sp != S:
        k = jnp.pad(k, ((0, 0), (0, Sp - S), (0, 0)))
        v = jnp.pad(v, ((0, 0), (0, Sp - S), (0, 0)))

    G = block_h if block_h is not None else _pick_block_h(H)
    assert H % G == 0, "block_h must divide the number of heads"

    grid = ((B * H) // G, Lp // tq, Sp // tk)

    # Explicit VMEM budget for the chosen tiles (double-buffered inputs/outputs
    # + f32 scratch + score/prob temporaries), clamped so it also fits v7x.
    in_item = jnp.dtype(q.dtype).itemsize
    out_item = jnp.dtype(out_dtype).itemsize
    vmem_need = (
        2 * G * tq * E * in_item +          # q double buffer
        2 * G * tk * E * in_item +          # k double buffer
        2 * G * tk * D * in_item +          # v double buffer
        2 * G * tq * D * out_item +         # out double buffer
        G * tq * (D + 2) * 4 +              # m / l / acc scratch (f32)
        4 * G * tq * tk * 4                 # s / p temporaries headroom (f32)
    )
    vmem_limit = int(min(64 * 1024 * 1024, max(32 * 1024 * 1024, 2 * vmem_need)))

    kernel = functools.partial(
        _mha_fwd_kernel, scale=scale_val, kv_len=S, block_k=tk,
        mask_kv_tail=(Sp != S))

    out = pl.pallas_call(
        kernel,
        out_shape=jax.ShapeDtypeStruct((B * H, Lp, D), out_dtype),
        grid_spec=pltpu.PrefetchScalarGridSpec(
            num_scalar_prefetch=0,
            grid=grid,
            in_specs=[
                pl.BlockSpec((G, tq, E), lambda g, i, j: (g, i, 0)),   # q
                pl.BlockSpec((G, tk, E), lambda g, i, j: (g, j, 0)),   # k
                pl.BlockSpec((G, tk, D), lambda g, i, j: (g, j, 0)),   # v
            ],
            out_specs=pl.BlockSpec((G, tq, D), lambda g, i, j: (g, i, 0)),
            scratch_shapes=[
                pltpu.VMEM((G, tq, 1), jnp.float32),   # running max m_i
                pltpu.VMEM((G, tq, 1), jnp.float32),   # running denominator l_i
                pltpu.VMEM((G, tq, D), jnp.float32),   # f32 output accumulator
            ],
        ),
        compiler_params=pltpu.CompilerParams(
            dimension_semantics=("parallel", "parallel", "arbitrary"),
            vmem_limit_bytes=vmem_limit),
    )(q, k, v)

    out = out[:, :L, :].reshape(B, H, L, D)
    out = jnp.transpose(out, (0, 2, 1, 3))          # back to [B, L, H, D]

    if returnA:
        # TODO(synk): returnA=True needs the full [B,H,L,S] attention matrix,
        # which defeats the online-softmax formulation; not implemented here.
        return out, None
    return out, None


if __name__ == "__main__":
    key = jax.random.PRNGKey(0)
    # Small shapes; L and S deliberately not multiples of the tile to exercise
    # the padding / tail-mask path, H > block-head-group interactions included.
    B, L, S, H, E, D = 2, 12, 10, 4, 32, 32

    kq, kk, kv = jax.random.split(key, 3)
    q = jax.random.normal(kq, (B, L, H, E), jnp.float32)
    k = jax.random.normal(kk, (B, S, H, E), jnp.float32)
    v = jax.random.normal(kv, (B, S, H, D), jnp.float32)

    # Pure-JAX reference (dropout is identity in eval mode).
    scale = 1.0 / math.sqrt(E)
    scores = jnp.einsum('blhe,bshe->bhls', q, k,
                        precision=jax.lax.Precision.HIGHEST)
    A = jax.nn.softmax(scale * scores, axis=-1)
    ref = jnp.einsum('bhls,bshd->blhd', A, v,
                     precision=jax.lax.Precision.HIGHEST)

    # Default (bf16 matmul) path.
    out, attn = multi_heads_attention(q, k, v)
    out = jax.block_until_ready(out)
    assert out.shape == (B, L, H, D)
    assert attn is None
    err_bf16 = float(jnp.max(jnp.abs(out - ref)))
    assert jnp.allclose(out, ref, atol=5e-2, rtol=5e-2), f"bf16 max abs err {err_bf16}"

    # Full-precision path (no bf16 cast).
    out_f32, _ = multi_heads_attention(q, k, v, cast_to_bf16=False)
    out_f32 = jax.block_until_ready(out_f32)
    err_f32 = float(jnp.max(jnp.abs(out_f32 - ref)))
    assert jnp.allclose(out_f32, ref, atol=2e-2, rtol=2e-2), f"f32 max abs err {err_f32}"

    print("KERNEL_OK")
</pallas_src>

<mosaic_0001>
module attributes {stable_mosaic.version = 11 : i64} {
  func.func @_mha_fwd_kernel(%arg0: i32, %arg1: i32, %arg2: i32, %arg3: memref<4x16x32xbf16, #tpu.memory_space<vmem>>, %arg4: memref<4x16x32xbf16, #tpu.memory_space<vmem>>, %arg5: memref<4x16x32xbf16, #tpu.memory_space<vmem>>, %arg6: memref<4x16x32xf32, #tpu.memory_space<vmem>>, %arg7: memref<4x16x1xf32, #tpu.memory_space<vmem>>, %arg8: memref<4x16x1xf32, #tpu.memory_space<vmem>>, %arg9: memref<4x16x32xf32, #tpu.memory_space<vmem>>) attributes {dimension_semantics = [#tpu.dimension_semantics<parallel>, #tpu.dimension_semantics<parallel>, #tpu.dimension_semantics<arbitrary>], iteration_bounds = array<i64: 2, 1, 1>, scalar_prefetch = 0 : i64, scratch_operands = 3 : i64, tpu.core_type = #tpu.core_type<tc>, window_params = [{transform_indices = @transform_0, window_bounds = array<i64: 4, 16, 32>}, {transform_indices = @transform_1, window_bounds = array<i64: 4, 16, 32>}, {transform_indices = @transform_2, window_bounds = array<i64: 4, 16, 32>}, {transform_indices = @transform_3, window_bounds = array<i64: 4, 16, 32>}]} {
    %c0_i32 = arith.constant 0 : i32
    %0 = arith.cmpi eq, %arg2, %c0_i32 : i32
    %1 = arith.extui %0 : i1 to i32
    %c0_i32_0 = arith.constant 0 : i32
    %2 = arith.cmpi ne, %1, %c0_i32_0 : i32
    scf.if %2 {
      %cst_35 = arith.constant 0xFF800000 : f32
      %39 = vector.broadcast %cst_35 : f32 to vector<4x16x1xf32>
      %c0_36 = arith.constant 0 : index
      %c0_37 = arith.constant 0 : index
      %c0_38 = arith.constant 0 : index
      %40 = vector.load %arg7[%c0_36, %c0_37, %c0_38] : memref<4x16x1xf32, #tpu.memory_space<vmem>>, vector<4x16x1xf32>
      tpu.vector_store %arg7[%c0_36, %c0_37, %c0_38], %39 {strides = array<i32>} : memref<4x16x1xf32, #tpu.memory_space<vmem>>, vector<4x16x1xf32>,
      %cst_39 = arith.constant 0.000000e+00 : f32
      %41 = vector.broadcast %cst_39 : f32 to vector<4x16x1xf32>
      %c0_40 = arith.constant 0 : index
      %c0_41 = arith.constant 0 : index
      %c0_42 = arith.constant 0 : index
      %42 = vector.load %arg8[%c0_40, %c0_41, %c0_42] : memref<4x16x1xf32, #tpu.memory_space<vmem>>, vector<4x16x1xf32>
      tpu.vector_store %arg8[%c0_40, %c0_41, %c0_42], %41 {strides = array<i32>} : memref<4x16x1xf32, #tpu.memory_space<vmem>>, vector<4x16x1xf32>,
      %cst_43 = arith.constant 0.000000e+00 : f32
      %43 = vector.broadcast %cst_43 : f32 to vector<4x16x32xf32>
      %c0_44 = arith.constant 0 : index
      %c0_45 = arith.constant 0 : index
      %c0_46 = arith.constant 0 : index
      %44 = vector.load %arg9[%c0_44, %c0_45, %c0_46] : memref<4x16x32xf32, #tpu.memory_space<vmem>>, vector<4x16x32xf32>
      tpu.vector_store %arg9[%c0_44, %c0_45, %c0_46], %43 {strides = array<i32>} : memref<4x16x32xf32, #tpu.memory_space<vmem>>, vector<4x16x32xf32>,
    } else {
    }
    %c0 = arith.constant 0 : index
    %c0_1 = arith.constant 0 : index
    %c0_2 = arith.constant 0 : index
    %3 = vector.load %arg3[%c0, %c0_1, %c0_2] : memref<4x16x32xbf16, #tpu.memory_space<vmem>>, vector<4x16x32xbf16>
    %cst = arith.constant 1.767580e-01 : bf16
    %4 = vector.broadcast %cst : bf16 to vector<4x16x32xbf16>
    %5 = arith.mulf %3, %4 : vector<4x16x32xbf16>
    %c0_3 = arith.constant 0 : index
    %c0_4 = arith.constant 0 : index
    %c0_5 = arith.constant 0 : index
    %6 = vector.load %arg4[%c0_3, %c0_4, %c0_5] : memref<4x16x32xbf16, #tpu.memory_space<vmem>>, vector<4x16x32xbf16>
    %c0_6 = arith.constant 0 : index
    %c0_7 = arith.constant 0 : index
    %c0_8 = arith.constant 0 : index
    %7 = vector.load %arg5[%c0_6, %c0_7, %c0_8] : memref<4x16x32xbf16, #tpu.memory_space<vmem>>, vector<4x16x32xbf16>
    %cst_9 = arith.constant dense<0.000000e+00> : vector<4x16x16xf32>
    %8 = tpu.matmul %5, %6, %cst_9 {dimension_numbers = #tpu.dot_dimension_numbers<[2], [2], [1], [1], [0, 0, 0, 1, 1, 1], [0], [0]>} : vector<4x16x32xbf16>, vector<4x16x32xbf16>, vector<4x16x16xf32> -> vector<4x16x16xf32>
    %c0_i32_10 = arith.constant 0 : i32
    %9 = arith.cmpi eq, %arg2, %c0_i32_10 : i32
    %10 = arith.extui %9 : i1 to i32
    %c0_i32_11 = arith.constant 0 : i32
    %11 = arith.cmpi ne, %10, %c0_i32_11 : i32
    %12 = scf.if %11 -> (vector<4x16x16xf32>) {
      %39 = tpu.iota {dimensions = array<i32: 2>} : vector<4x16x16xi32>
      %c16_i32 = arith.constant 16 : i32
      %40 = arith.muli %arg2, %c16_i32 : i32
      %c10_i32 = arith.constant 10 : i32
      %41 = arith.subi %c10_i32, %40 : i32
      %42 = vector.broadcast %41 : i32 to vector<4x16x16xi32>
      %43 = arith.cmpi slt, %39, %42 : vector<4x16x16xi32>
      %cst_35 = arith.constant -1.000000e+30 : f32
      %44 = vector.broadcast %cst_35 : f32 to vector<4x16x16xf32>
      %45 = arith.select %43, %8, %44 : vector<4x16x16xi1>, vector<4x16x16xf32>
      scf.yield %45 : vector<4x16x16xf32>
    } else {
      scf.yield %8 : vector<4x16x16xf32>
    }
    %c0_12 = arith.constant 0 : index
    %c0_13 = arith.constant 0 : index
    %c0_14 = arith.constant 0 : index
    %13 = vector.load %arg7[%c0_12, %c0_13, %c0_14] : memref<4x16x1xf32, #tpu.memory_space<vmem>>, vector<4x16x1xf32>
    %cst_15 = arith.constant dense<0xFF800000> : vector<4x16xf32>
    %14 = vector.multi_reduction <maximumf>, %12, %cst_15 [2] : vector<4x16x16xf32> to vector<4x16xf32>
    %15 = vector.shape_cast %14 : vector<4x16xf32> to vector<4x16x1xf32>
    %16 = arith.maximumf %13, %15 : vector<4x16x1xf32>
    %17 = arith.subf %13, %16 : vector<4x16x1xf32>
    %18 = math.exp %17 : vector<4x16x1xf32>
    %19 = vector.broadcast %16 : vector<4x16x1xf32> to vector<4x16x16xf32>
    %20 = arith.subf %12, %19 : vector<4x16x16xf32>
    %21 = math.exp %20 : vector<4x16x16xf32>
    %c0_16 = arith.constant 0 : index
    %c0_17 = arith.constant 0 : index
    %c0_18 = arith.constant 0 : index
    %22 = vector.load %arg8[%c0_16, %c0_17, %c0_18] : memref<4x16x1xf32, #tpu.memory_space<vmem>>, vector<4x16x1xf32>
    %23 = arith.mulf %18, %22 : vector<4x16x1xf32>
    %cst_19 = arith.constant dense<0.000000e+00> : vector<4x16xf32>
    %24 = vector.multi_reduction <add>, %21, %cst_19 [2] : vector<4x16x16xf32> to vector<4x16xf32>
    %25 = vector.shape_cast %24 : vector<4x16xf32> to vector<4x16x1xf32>
    %26 = arith.addf %23, %25 : vector<4x16x1xf32>
    %c0_20 = arith.constant 0 : index
    %c0_21 = arith.constant 0 : index
    %c0_22 = arith.constant 0 : index
    %27 = vector.load %arg8[%c0_20, %c0_21, %c0_22] : memref<4x16x1xf32, #tpu.memory_space<vmem>>, vector<4x16x1xf32>
    tpu.vector_store %arg8[%c0_20, %c0_21, %c0_22], %26 {strides = array<i32>} : memref<4x16x1xf32, #tpu.memory_space<vmem>>, vector<4x16x1xf32>,
    %c0_23 = arith.constant 0 : index
    %c0_24 = arith.constant 0 : index
    %c0_25 = arith.constant 0 : index
    %28 = vector.load %arg9[%c0_23, %c0_24, %c0_25] : memref<4x16x32xf32, #tpu.memory_space<vmem>>, vector<4x16x32xf32>
    %29 = vector.broadcast %18 : vector<4x16x1xf32> to vector<4x16x32xf32>
    %30 = arith.mulf %29, %28 : vector<4x16x32xf32>
    %31 = arith.truncf %21 : vector<4x16x16xf32> to vector<4x16x16xbf16>
    %cst_26 = arith.constant dense<0.000000e+00> : vector<4x16x32xf32>
    %32 = tpu.matmul %31, %7, %cst_26 {dimension_numbers = #tpu.dot_dimension_numbers<[2], [1], [1], [2], [0, 0, 0, 1, 1, 2], [0], [0]>} : vector<4x16x16xbf16>, vector<4x16x32xbf16>, vector<4x16x32xf32> -> vector<4x16x32xf32>
    %33 = arith.addf %30, %32 : vector<4x16x32xf32>
    %c0_27 = arith.constant 0 : index
    %c0_28 = arith.constant 0 : index
    %c0_29 = arith.constant 0 : index
    %34 = vector.load %arg9[%c0_27, %c0_28, %c0_29] : memref<4x16x32xf32, #tpu.memory_space<vmem>>, vector<4x16x32xf32>
    tpu.vector_store %arg9[%c0_27, %c0_28, %c0_29], %33 {strides = array<i32>} : memref<4x16x32xf32, #tpu.memory_space<vmem>>, vector<4x16x32xf32>,
    %c0_30 = arith.constant 0 : index
    %c0_31 = arith.constant 0 : index
    %c0_32 = arith.constant 0 : index
    %35 = vector.load %arg7[%c0_30, %c0_31, %c0_32] : memref<4x16x1xf32, #tpu.memory_space<vmem>>, vector<4x16x1xf32>
    tpu.vector_store %arg7[%c0_30, %c0_31, %c0_32], %16 {strides = array<i32>} : memref<4x16x1xf32, #tpu.memory_space<vmem>>, vector<4x16x1xf32>,
    %c0_i32_33 = arith.constant 0 : i32
    %36 = arith.cmpi eq, %arg2, %c0_i32_33 : i32
    %37 = arith.extui %36 : i1 to i32
    %c0_i32_34 = arith.constant 0 : i32
    %38 = arith.cmpi ne, %37, %c0_i32_34 : i32
    scf.if %38 {
      %c0_35 = arith.constant 0 : index
      %c0_36 = arith.constant 0 : index
      %c0_37 = arith.constant 0 : index
      %39 = vector.load %arg8[%c0_35, %c0_36, %c0_37] : memref<4x16x1xf32, #tpu.memory_space<vmem>>, vector<4x16x1xf32>
      %40 = tpu.reciprocal %39 {approx = true} : vector<4x16x1xf32> -> vector<4x16x1xf32>
      %c0_38 = arith.constant 0 : index
      %c0_39 = arith.constant 0 : index
      %c0_40 = arith.constant 0 : index
      %41 = vector.load %arg9[%c0_38, %c0_39, %c0_40] : memref<4x16x32xf32, #tpu.memory_space<vmem>>, vector<4x16x32xf32>
      %42 = vector.broadcast %40 : vector<4x16x1xf32> to vector<4x16x32xf32>
      %43 = arith.mulf %41, %42 : vector<4x16x32xf32>
      %c0_41 = arith.constant 0 : index
      %c0_42 = arith.constant 0 : index
      %c0_43 = arith.constant 0 : index
      %44 = vector.load %arg6[%c0_41, %c0_42, %c0_43] : memref<4x16x32xf32, #tpu.memory_space<vmem>>, vector<4x16x32xf32>
      tpu.vector_store %arg6[%c0_41, %c0_42, %c0_43], %43 {strides = array<i32>} : memref<4x16x32xf32, #tpu.memory_space<vmem>>, vector<4x16x32xf32>,
    } else {
    }
    return
  }
  func.func @transform_0(%arg0: i32, %arg1: i32, %arg2: i32) -> (i32, i32, i32) {
    %c0_i32 = arith.constant 0 : i32
    %c0_i32_0 = arith.constant 0 : i32
    return %arg0, %arg1, %c0_i32 : i32, i32, i32
  }
  func.func @transform_1(%arg0: i32, %arg1: i32, %arg2: i32) -> (i32, i32, i32) {
    %c0_i32 = arith.constant 0 : i32
    %c0_i32_0 = arith.constant 0 : i32
    return %arg0, %arg2, %c0_i32 : i32, i32, i32
  }
  func.func @transform_2(%arg0: i32, %arg1: i32, %arg2: i32) -> (i32, i32, i32) {
    %c0_i32 = arith.constant 0 : i32
    %c0_i32_0 = arith.constant 0 : i32
    return %arg0, %arg2, %c0_i32 : i32, i32, i32
  }
  func.func @transform_3(%arg0: i32, %arg1: i32, %arg2: i32) -> (i32, i32, i32) {
    %c0_i32 = arith.constant 0 : i32
    %c0_i32_0 = arith.constant 0 : i32
    return %arg0, %arg1, %c0_i32 : i32, i32, i32
  }
}

</mosaic_0001>

<bundles_post_ra>
// kernel: tpu_custom_call.1
= control target key start
LH: loop header
LB: loop body
LE: loop exit
PB: predicated region body
PF: predicated region fallthrough
CT: control target
= control target key end

     0   :  { %s1972_s0 = inlined_call_operand.hbm [shape: bf16[8,16,32], index: 0, kind: input, shape index: {}]   ;;  %s1973_s1 = inlined_call_operand.hbm [shape: bf16[8,16,32], index: 1, kind: input, shape index: {}]   ;;  %s1974_s2 = inlined_call_operand.hbm [shape: bf16[8,16,32], index: 2, kind: input, shape index: {}]   ;;  %s1975_s3 = inlined_call_operand.hbm [shape: f32[8,16,32], index: 3, kind: output, shape index: {}]  }
   0x1   :  { %1981 = sst [smem:[#allocation20_spill]] %s1973_s1 }
   0x2   :  { %8 = vsyncpa [#allocation6], 0 }
   0x3   :  { %10 = vsyncpa [#allocation6 + $0x1], 0 }
   0x4   :  { %11 = vsyncpa [#allocation9], 0 }
   0x5   :  { %13 = vsyncpa [#allocation9 + $0x1], 0 }
   0x6   :  { %14 = vsyncpa [#allocation7], 0 }
   0x7   :  { %16 = vsyncpa [#allocation7 + $0x1], 0  ;;  %s1616_s12 = smov 0   ;;  %s1618_s13 = smov 0  }
   0x8   :  { %s1620_s14 = smov 0   ;;  %s1622_s15 = smov 0  }
   0x9   :  { %s1624_s16 = smov 0   ;;  %s1626_s17 = smov 0  }
   0xa LB: > { %1982 = sst [smem:[#allocation15_spill]] %s1575_s14  ;;  %s1647_s18 = sadd.s32 4294967295, %s1587_s17   ;;  %s1587_s17 = sphi %s1626_s17, %s22_s17   ;;  %s1583_s16 = sphi %s1624_s16, %s1998_s16   ;;  %s1579_s15 = sphi %s1622_s15, %s1997_s15   ;;  %s1575_s14 = sphi %s1620_s14, %s1996_s14   ;;  %s1571_s13 = sphi %s1618_s13, %s2000_s13   ;;  %s1567_s12 = sphi %s1616_s12, %s1999_s12  }
   0xb   : > { %1983 = sst [smem:[#allocation16_spill]] %s1583_s16  ;;  %s1180_s19 = sadd.s32 4294967294, %s1587_s17  }
   0xc   : > { %1984 = sst [smem:[#allocation17_spill]] %s1587_s17  ;;  %s41_s20 = sadd.s32 1, %s1583_s16 }
   0xd   : > { %s50_s21 = sadd.s32 1, %s1575_s14  ;;  %p43_p0 = scmp.ge.s32.totalorder %s41_s20, 2 }
   0xe   : > { %p57_p1 = scmp.ne.s32.totalorder %s1575_s14, %s1571_s13  ;;  %p58_p2 = scmp.eq.s32.totalorder %s1587_s17, 0 }
   0xf   : > { %p63_p3 = scmp.ne.s32.totalorder %s1571_s13, %s1567_s12  ;;  %s2002_s20 = smov (%p43_p0, %s41_s20), 0 }
  0x10   : > { %1985 = sst [smem:[#allocation18_spill]] %s2002_s20  ;;  %p1659_p4 = por %p58_p2, %p57_p1 }
  0x11   : > { %p64_p5 = scmp.eq.s32.totalorder %s1647_s18, 0  ;;  %s45_s23 = ssub.s32 %s1583_s16, %s2002_s20 }
  0x12   : > { %p145_p6 = scmp.eq.s32.totalorder %s1647_s18, 1  ;;  %p48_p7 = scmp.eq.s32.totalorder %s45_s23, 0 }
  0x13   : > { %p1667_p8 = por %p64_p5, %p63_p3  ;;  %p151_p10 = scmp.eq.s32.totalorder %s1180_s19, 1 }
  0x14   : > { %p1671_p9 = por %p145_p6, %p57_p1  ;;  %p1182_p12 = scmp.ge.s32.totalorder %s1587_s17, 2 }
  0x15   : > { %s1676_s26 = scalar_select %p48_p7, %s1575_s14, %s50_s21  }
  0x16   : > { %p1678_p11 = por %p151_p10, %p63_p3  ;;  %p1303_p13 = scmp.lt.s32.totalorder %s1587_s17, 2 }
  0x17   : > { %1989 = sst [smem:[#allocation19_spill]] %s1676_s26  ;;  %s171_s28 = sand.u32 1, %s1575_s14  }
  0x18   : > { %s1685_s29 = sshll.u32 %s171_s28, 5  ;;  %s1247_s30 = sshll.u32 %s1583_s16, 5 }
  0x19   : > { %p1690_p0 = pnand %p1303_p13, %p1659_p4  ;;  %s196_s5 = sand.u32 1, %s1587_s17  }
  0x1a   : > { %s1992_s1 = sld [smem:[#allocation20_spill]]  ;;  %s200_s10 = scalar_lea.vmem [#allocation8], %s1685_s29 }
  0x1b   : > { %s211_s11 = sshll.u32 %s200_s10, 4  ;;  %s197_s19 = scalar_lea.sflag [#allocation9], %s196_s5  ;;  %s212_s11 = int_to_ptr.vmem [resolvable:$true] %s211_s11 }
  0x1c   : > { %s1589_s21 = smov 64   ;;  %s1590_s22 = smov 4  }
  0x1d   : > { %p1195_p1 = scmp.ge.s32.totalorder %s1587_s17, 1  ;;  %p244_p2 = scmp.lt.s32.totalorder %s1587_s17, 3 }
  0x1e   : > { %s172_s5 = scalar_lea.sflag [#allocation6], %s171_s28  ;;  %s233_s16 = scalar_lea.hbm %s1974_s2, %s1247_s30 }
  0x1f   : > { %p1703_p3 = pnand %p1195_p1, %p244_p2  ;;  %s234_s26 = sshll.u32 %s233_s16, 4  ;;  %s235_s26 = int_to_ptr.hbm [resolvable:$true] %s234_s26 }
  0x20   : > { %s208_s8 = scalar_lea.hbm %s1992_s1, %s1247_s30  ;;  %s175_s1 = scalar_lea.vmem [#allocation5], %s1685_s29 }
  0x21   : > { %s209_s9 = sshll.u32 %s208_s8, 4  ;;  %s183_s8 = scalar_lea.hbm %s1972_s0, %s1247_s30  ;;  %s210_s9 = int_to_ptr.hbm [resolvable:$true] %s209_s9 }
  0x22   : > { %1295 = dma.hbm_to_vmem [thread:$0]  (!%p1690_p0), %s210_s9, 512, %s212_s11, %s197_s19, %s1589_s21, %s1589_s21, %s1590_s22  }
  0x23   : > { %s184_s10 = sshll.u32 %s183_s8, 4  ;;  %s186_s20 = sshll.u32 %s175_s1, 4  ;;  %s185_s10 = int_to_ptr.hbm [resolvable:$true] %s184_s10  ;;  %s187_s20 = int_to_ptr.vmem [resolvable:$true] %s186_s20 }
  0x24   : > { %1292 = dma.hbm_to_vmem [thread:$0]  (!%p1690_p0), %s185_s10, 512, %s187_s20, %s172_s5, %s1589_s21, %s1589_s21, %s1590_s22  }
  0x25   : > { %s225_s14 = scalar_lea.vmem [#allocation10], %s1685_s29  ;;  %248 = sbr.rel (%p1703_p3) target bundleno = 709 (0x2c5), region = 32 }
  0x26   : > { %s236_s17 = sshll.u32 %s225_s14, 4  ;;  %s1722_s1 = sand.u32 (!%p1703_p3), 1, %s1571_s13   ;;  %s237_s17 = int_to_ptr.vmem [resolvable:$true] %s236_s17 }
  0x27   : > { %1298 = dma.hbm_to_vmem [thread:$0]  (!%p1690_p0), %s235_s26, 512, %s237_s17, %s197_s19, %s1589_s21, %s1589_s21, %s1590_s22  }
  0x28   : > { %s1725_s20 = sshll.u32 (!%p1703_p3), %s1722_s1, 5  ;;  %s251_s28 = scalar_lea.sflag (!%p1703_p3), [#allocation6], %s1722_s1 }
  0x29   : > { %s254_s16 = scalar_lea.vmem (!%p1703_p3), [#allocation5], %s1725_s20 }
  0x2a   : > { %1554 = dma.done.wait (%p1667_p8), %s251_s28, 512  }
  0x2b   : > { %1556 = vsyncadd (%p1667_p8), %s251_s28, 4294966784  ;;  %s260_s14 = sand.u32 1, %s1647_s18   ;;  %s264_s26 = scalar_lea.vmem [#allocation8], %s1725_s20 }
  0x2c   : > { %s261_s17 = scalar_lea.sflag [#allocation9], %s260_s14 }
  0x2d   : > { %1558 = dma.done.wait (%p1667_p8), %s261_s17, 1024  }
  0x2e   : > { %1560 = vsyncadd (%p1667_p8), %s261_s17, 4294966272  ;;  %vm338_vm0 = vcmask 261120   ;;  %v1252_v0 = vld [vmem:[%s264_s26] sm:$0xff]  ;;  %v1253_v1 = vld [vmem:[%s264_s26 + $0x8] sm:$0xff]  ;;  %v519_v48 = vlaneseq  ;;  %vm321_vm1 = vcmask 7168   ;;  %v1591_v50 = vmov -inf  }
  0x2f   : > { %v1254_v2 = vld [vmem:[%s264_s26 + $0x10] sm:$0xff]  ;;  %v1255_v3 = vld [vmem:[%s264_s26 + $0x18] sm:$0xff]  ;;  %v1263_v4 = vld [vmem:[%s254_s16] sm:$0xff]   ;;  %v410_v6 = vsel %vm338_vm0, %v1252_v0, 0  ;;  %v440_v7 = vsel %vm338_vm0, %v1253_v1, 0  ;;  %324 = vst.msk [vmem:[#allocation2 + $0x10] sm:$0xff] %vm321_vm1, %v1591_v50 }
  0x30   : > { %v1278_v5 = vld [vmem:[%s254_s16 + $0x8] sm:$0xff]   ;;  %v470_v8 = vsel %vm338_vm0, %v1254_v2, 0  ;;  %v1264_v9 = vunpack.c.l.bf16 %v1263_v4  ;;  %v1279_v10 = vld [vmem:[%s254_s16 + $0x10] sm:$0xff]   ;;  %v1280_v11 = vld [vmem:[%s254_s16 + $0x18] sm:$0xff]   ;;  %419 = vmatpush.bf16.xpose.msra.mxu0 %v410_v6  ;;  %449 = vmatpush.bf16.xpose.msra.mxu1 %v440_v7  ;;  %v500_v12 = vsel %vm338_vm0, %v1255_v3, 0  ;;  %v1265_v13 = vunpack.c.h.bf16 %v1263_v4  ;;  %322 = vst.msk [vmem:[#allocation2] sm:$0xff] %vm321_vm1, %v1591_v50 }
  0x31   : > { %v1268_v14 = vunpack.c.l.bf16 %v1278_v5  ;;  %v1269_v15 = vunpack.c.h.bf16 %v1278_v5  ;;  %479 = vmatpush.bf16.xpose.msra.mxu2 %v470_v8  ;;  %509 = vmatpush.bf16.xpose.msra.mxu3 %v500_v12  ;;  %v1272_v17 = vunpack.c.l.bf16 %v1279_v10  ;;  %v1273_v18 = vunpack.c.h.bf16 %v1279_v10  ;;  %323 = vst.msk [vmem:[#allocation2 + $0x8] sm:$0xff] %vm321_vm1, %v1591_v50  ;;  %s274_s18 = scalar_lea.vmem [#allocation10], %s1725_s20  ;;  %s1199_s24 = sshll.u32 %s1722_s1, 6 }
  0x32   : > { %v363_v16 = vmul.f32 0.17675781, %v1264_v9  ;;  %v1276_v19 = vunpack.c.l.bf16 %v1280_v11  ;;  %v364_v20 = vmul.f32 0.17675781, %v1265_v13  ;;  %v1277_v23 = vunpack.c.h.bf16 %v1280_v11  ;;  %325 = vst.msk [vmem:[#allocation2 + $0x18] sm:$0xff] %vm321_vm1, %v1591_v50  ;;  %s1915_s29 = scalar_lea.vmem [#allocation11], %s1199_s24  ;;  %s1261_s30 = sshll.u32 %s1579_s15, 6 }
  0x33   : > { %v365_v21 = vmul.f32 0.17675781, %v1268_v14  ;;  %v366_v22 = vmul.f32 0.17675781, %v1269_v15  ;;  %v367_v25 = vmul.f32 0.17675781, %v1272_v17  ;;  %v368_v26 = vmul.f32 0.17675781, %v1273_v18  ;;  %326 = vst.msk [vmem:[#allocation2 + $0x20] sm:$0xff] %vm321_vm1, %v1591_v50  ;;  %s1036_s21 = scalar_lea.hbm %s1975_s3, %s1261_s30  ;;  %s1037_s22 = sshll.u32 %s1915_s29, 4  ;;  %s1038_s22 = int_to_ptr.vmem [resolvable:$true] %s1037_s22 }
  0x34   : > { %v371_v24 = vpack.c.bf16 %v363_v16, %v363_v16  ;;  %v369_v27 = vmul.f32 0.17675781, %v1276_v19  ;;  %v372_v28 = vpack.c.bf16 %v364_v20, %v364_v20  ;;  %v370_v31 = vmul.f32 0.17675781, %v1277_v23  ;;  %327 = vst.msk [vmem:[#allocation2 + $0x28] sm:$0xff] %vm321_vm1, %v1591_v50  ;;  %s1039_s23 = sshll.u32 %s1036_s21, 4  ;;  %s1022_s15 = scalar_lea.sflag [#allocation7], %s1722_s1  ;;  %s1040_s23 = int_to_ptr.hbm [resolvable:$true] %s1039_s23 }
  0x35   : > { %v373_v29 = vpack.c.bf16 %v365_v21, %v365_v21  ;;  %v374_v30 = vpack.c.bf16 %v366_v22, %v366_v22  ;;  %v375_v33 = vpack.c.bf16 %v367_v25, %v367_v25  ;;  %v376_v34 = vpack.c.bf16 %v368_v26, %v368_v26  ;;  %328 = vst.msk [vmem:[#allocation2 + $0x30] sm:$0xff] %vm321_vm1, %v1591_v50  ;;  %s1515_s6 = sshra.s32 %s1040_s23, 4  ;;  %s1521_s5 = scalar_lea.hbm %s1975_s3, 128  ;;  %s1516_s6 = int_to_ptr.hbm [resolvable:$true] %s1515_s6 }
  0x36   : > { %v397_v32 = vunpack.c.l.b16 %v371_v24  ;;  %v377_v35 = vpack.c.bf16 %v369_v27, %v369_v27  ;;  %v398_v36 = vunpack.c.l.b16 %v372_v28  ;;  %v378_v39 = vpack.c.bf16 %v370_v31, %v370_v31  ;;  %329 = vst.msk [vmem:[#allocation2 + $0x38] sm:$0xff] %vm321_vm1, %v1591_v50  ;;  %v554_v13 = vld [vmem:[#allocation2 + $0x10] sm:$0xff]  ;;  %s1517_s7 = scalar_lea.hbm %s1516_s6, 64  ;;  %p1522_p7 = scmp.lt.s32.totalorder %s1516_s6, %s1975_s3 }
  0x37   : > { %v428_v37 = vunpack.c.l.b16 %v373_v29  ;;  %v429_v38 = vunpack.c.l.b16 %v374_v30  ;;  %v458_v40 = vunpack.c.l.b16 %v375_v33  ;;  %v459_v41 = vunpack.c.l.b16 %v376_v34  ;;  %v552_v14 = vld [vmem:[#allocation2] sm:$0xff]  ;;  %p1518_p4 = scmp.ne.s32.totalorder %s1516_s6, %s1517_s7  ;;  %p1523_p8 = scmp.lt.s32.totalorder %s1521_s5, %s1517_s7 }
  0x38   : > { %v488_v42 = vunpack.c.l.b16 %v377_v35  ;;  %v399_v43 = vpack.c.b16 %v398_v36, %v397_v32  ;;  %v489_v45 = vunpack.c.l.b16 %v378_v39  ;;  %v520_v49 = vand.u32 127, %v519_v48  ;;  %v553_v21 = vld [vmem:[#allocation2 + $0x8] sm:$0xff] }
  0x39   : > { %v430_v44 = vpack.c.b16 %v429_v38, %v428_v37  ;;  %v460_v46 = vpack.c.b16 %v459_v41, %v458_v40  ;;  %vm560_vm3 = vcmask 130048   ;;  %v1592_v11 = vmov 0   ;;  %v555_v29 = vld [vmem:[#allocation2 + $0x18] sm:$0xff]  ;;  %p1519_p5 = pnand %p1518_p4, %p1671_p9  ;;  %p1524_p10 = por %p1523_p8, %p1522_p7 }
  0x3a   : > { %1204 = vmatmul.msk.bf16.vlgmr.msra.gmra.mxu0 %vm338_vm0, %v399_v43  ;;  %v490_v47 = vpack.c.b16 %v489_v45, %v488_v42  ;;  %vm524_vm2 = vcmp.lt.s32.totalorder %v520_v49, 10  ;;  %1362 = vset.pattern.permute.xlu1 %v1592_v11  ;;  %v1593_v12 = vmov 0.0   ;;  %v556_v20 = vld [vmem:[#allocation2 + $0x20] sm:$0xff] }
  0x3b   : > { %1209 = vmatmul.msk.bf16.vlgmr.msra.gmra.mxu1 %vm338_vm0, %v430_v44  ;;  %1214 = vmatmul.msk.bf16.vlgmr.msra.gmra.mxu2 %vm338_vm0, %v460_v46  ;;  %340 = vst.msk [vmem:[#allocation4 + $0x8] sm:$0xff] %vm338_vm0, %v1593_v12  ;;  %v557_v30 = vld [vmem:[#allocation2 + $0x28] sm:$0xff]  ;;  %p1520_p6 = pneg %p1519_p5 }
  0x3c   : > { %1219 = vmatmul.msk.bf16.vlgmr.msra.gmra.mxu3 %vm338_vm0, %v490_v47  ;;  %1360 = vset.pattern.permute.xlu2 %v1592_v11  ;;  %330 = vst.msk [vmem:[#allocation3] sm:$0xff] %vm321_vm1, %v1593_v12  ;;  %v558_v19 = vld [vmem:[#allocation2 + $0x30] sm:$0xff] }
  0x3d   : > { %1361 = vset.pattern.permute.xlu0 %v1592_v11  ;;  %331 = vst.msk [vmem:[#allocation3 + $0x8] sm:$0xff] %vm321_vm1, %v1593_v12  ;;  %v1818_v38 = vld [vmem:[#allocation2 + $0x38] sm:$0xff]  ;;  %p1525_p13 = pnand %p1524_p10, %p1520_p6 }
  0x3e   : > { %332 = vst.msk [vmem:[#allocation3 + $0x10] sm:$0xff] %vm321_vm1, %v1593_v12 }
  0x3f   : > { %333 = vst.msk [vmem:[#allocation3 + $0x18] sm:$0xff] %vm321_vm1, %v1593_v12 }
  0x40   : > { %334 = vst.msk [vmem:[#allocation3 + $0x20] sm:$0xff] %vm321_vm1, %v1593_v12 }
  0x41   : > { %335 = vst.msk [vmem:[#allocation3 + $0x28] sm:$0xff] %vm321_vm1, %v1593_v12 }
  0x42   : > { %336 = vst.msk [vmem:[#allocation3 + $0x30] sm:$0xff] %vm321_vm1, %v1593_v12 }
  0x43   : > { %337 = vst.msk [vmem:[#allocation3 + $0x38] sm:$0xff] %vm321_vm1, %v1593_v12 }
  0x44   : > { %339 = vst.msk [vmem:[#allocation4] sm:$0xff] %vm338_vm0, %v1593_v12 }
  0x45   : > { %341 = vst.msk [vmem:[#allocation4 + $0x10] sm:$0xff] %vm338_vm0, %v1593_v12 }
  0x46   : > { %342 = vst.msk [vmem:[#allocation4 + $0x18] sm:$0xff] %vm338_vm0, %v1593_v12 }
  0x47   : > { %343 = vst.msk [vmem:[#allocation4 + $0x20] sm:$0xff] %vm338_vm0, %v1593_v12 }
  0x48   : > { %344 = vst.msk [vmem:[#allocation4 + $0x28] sm:$0xff] %vm338_vm0, %v1593_v12 }
  0x49   : > { %345 = vst.msk [vmem:[#allocation4 + $0x30] sm:$0xff] %vm338_vm0, %v1593_v12 }
  0x4a   : > { %346 = vst.msk [vmem:[#allocation4 + $0x38] sm:$0xff] %vm338_vm0, %v1593_v12 }
  0xb7   : > { %v421_v51 = vpop.f32.mrf.mxu0 }
  0xb8   : > { %v451_v52 = vpop.f32.mrf.mxu1  ;;  %v1753_v53 = vsel %vm524_vm2, %v421_v51, -1e+30 }
  0xb9   : > { %v1756_v54 = vsel %vm524_vm2, %v451_v52, -1e+30  ;;  %v561_v56 = vsel %vm560_vm3, %v1753_v53, -inf }
  0xba   : > { %v567_v55 = vsel %vm560_vm3, %v1756_v54, -inf  ;;  %562 = vmax.xlane.f32.xlu2 %v561_v56 }
  0xbb   : > { %568 = vmax.xlane.f32.xlu0 %v567_v55 }
  0xbe   : > { %v481_v57 = vpop.f32.mrf.mxu2 }
  0xbf   : > { %v1766_v58 = vsel %vm524_vm2, %v481_v57, -1e+30  ;;  %v511_v59 = vpop.f32.mrf.mxu3  ;;  %v423_v60 = vpop.f32.mrf.mxu0 }
  0xc0   : > { %v1769_v61 = vsel %vm524_vm2, %v511_v59, -1e+30  ;;  %v1772_v62 = vsel %vm524_vm2, %v423_v60, -1e+30  ;;  %v573_v63 = vsel %vm560_vm3, %v1766_v58, -inf  ;;  %v453_v2 = vpop.f32.mrf.mxu1 }
  0xc1   : > { %v579_v0 = vsel %vm560_vm3, %v1769_v61, -inf  ;;  %v564_v1 = vsel %vm560_vm3, %v1772_v62, -inf  ;;  %v1781_v3 = vsel %vm524_vm2, %v453_v2, -1e+30 }
  0xc2   : > { %580 = vmax.xlane.f32.xlu1 %v579_v0  ;;  %565 = vmax.xlane.f32.xlu2 %v564_v1  ;;  %v570_v6 = vsel %vm560_vm3, %v1781_v3, -inf  ;;  %v1259_v1 = vld [vmem:[%s274_s18 + $0x18] sm:$0xff] }
  0xc3   : > { %574 = vmax.xlane.f32.xlu0 %v573_v63  ;;  %907 = vmatpush.bf16.msrb.mxu3 %v1259_v1 }
  0xc6   : > { %v483_v4 = vpop.f32.mrf.mxu2 }
  0xc7   : > { %v1784_v5 = vsel %vm524_vm2, %v483_v4, -1e+30  ;;  %v513_v8 = vpop.f32.mrf.mxu3 }
  0xc8   : > { %v576_v7 = vsel %vm560_vm3, %v1784_v5, -inf  ;;  %v1791_v9 = vsel %vm524_vm2, %v513_v8, -1e+30  ;;  %v1256_v8 = vld [vmem:[%s274_s18] sm:$0xff] }
  0xc9   : > { %v582_v10 = vsel %vm560_vm3, %v1791_v9, -inf  ;;  %823 = vmatpush.bf16.msrb.mxu0 %v1256_v8 }
  0xca   : > { %571 = vmax.xlane.f32.xlu1 %v570_v6 }
  0xcb   : > { %577 = vmax.xlane.f32.xlu0 %v576_v7 }
  0xd2   : > { %583 = vmax.xlane.f32.xlu1 %v582_v10  ;;  %v1258_v10 = vld [vmem:[%s274_s18 + $0x10] sm:$0xff] }
  0xd3   : > { %879 = vmatpush.bf16.msrb.mxu2 %v1258_v10 }
 0x12d   : > { %v563_v16 = vpop.xlane.xlu2 %562 }
 0x12e   : > { %v569_v15 = vpop.xlane.xlu0 %568  ;;  %v585_v18 = vmax.f32 %v552_v14, %v563_v16 }
 0x12f   : > { %v587_v17 = vmax.f32 %v554_v13, %v569_v15 }
 0x130   : > { %930 = vst.msk [vmem:[#allocation2] sm:$0xff] %vm321_vm1, %v585_v18  ;;  %v593_v36 = vsub.f32 %v552_v14, %v585_v18 }
 0x131   : > { %932 = vst.msk [vmem:[#allocation2 + $0x10] sm:$0xff] %vm321_vm1, %v587_v17  ;;  %v595_v28 = vsub.f32 %v554_v13, %v587_v17 }
 0x132   : > { %v601_v39 = vmul.f32 1.442695, %v593_v36 }
 0x133   : > { %v605_v31 = vmul.f32 1.442695, %v595_v28 }
 0x135   : > { %v581_v22 = vpop.xlane.xlu1 %580  ;;  %v566_v26 = vpop.xlane.xlu2 %565  ;;  %1363 = vpow2.f32 %v605_v31 }
 0x136   : > { %v575_v23 = vpop.xlane.xlu0 %574  ;;  %v591_v24 = vmax.f32 %v558_v19, %v581_v22  ;;  %v586_v27 = vmax.f32 %v553_v21, %v566_v26  ;;  %1365 = vpow2.f32 %v601_v39 }
 0x137   : > { %v589_v25 = vmax.f32 %v556_v20, %v575_v23 }
 0x138   : > { %936 = vst.msk [vmem:[#allocation2 + $0x30] sm:$0xff] %vm321_vm1, %v591_v24  ;;  %649 = vperm.xlu1 %1362, %v591_v24   ;;  %v599_v45 = vsub.f32 %v558_v19, %v591_v24  ;;  %v594_v46 = vsub.f32 %v553_v21, %v586_v27 }
 0x139   : > { %639 = vperm.xlu2 %1360, %v589_v25   ;;  %934 = vst.msk [vmem:[#allocation2 + $0x20] sm:$0xff] %vm321_vm1, %v589_v25  ;;  %v597_v37 = vsub.f32 %v556_v20, %v589_v25 }
 0x13a   : > { %931 = vst.msk [vmem:[#allocation2 + $0x8] sm:$0xff] %vm321_vm1, %v586_v27  ;;  %v613_v47 = vmul.f32 1.442695, %v599_v45  ;;  %v603_v49 = vmul.f32 1.442695, %v594_v46 }
 0x13b   : > { %v609_v40 = vmul.f32 1.442695, %v597_v37  ;;  %v1823_v43 = vpop.eup %1363 }
 0x13c   : > { %v1831_v48 = vpop.eup %1365 }
 0x13d   : > { %v572_v32 = vpop.xlane.xlu1 %571  ;;  %1367 = vpow2.f32 %v609_v40 }
 0x13e   : > { %v578_v33 = vpop.xlane.xlu0 %577  ;;  %v588_v34 = vmax.f32 %v555_v29, %v572_v32  ;;  %1369 = vpow2.f32 %v613_v47 }
 0x13f   : > { %v590_v35 = vmax.f32 %v557_v30, %v578_v33  ;;  %1371 = vpow2.f32 %v603_v49 }
 0x140   : > { %933 = vst.msk [vmem:[#allocation2 + $0x18] sm:$0xff] %vm321_vm1, %v588_v34  ;;  %624 = vperm.xlu1 %1362, %v586_v27   ;;  %v596_v51 = vsub.f32 %v555_v29, %v588_v34 }
 0x141   : > { %644 = vperm.xlu0 %1361, %v590_v35   ;;  %935 = vst.msk [vmem:[#allocation2 + $0x28] sm:$0xff] %vm321_vm1, %v590_v35  ;;  %619 = vperm.xlu2 %1360, %v585_v18   ;;  %v598_v52 = vsub.f32 %v557_v30, %v590_v35 }
 0x142   : > { %v607_v55 = vmul.f32 1.442695, %v596_v51 }
 0x143   : > { %v1833_v50 = vpop.eup %1367  ;;  %v611_v56 = vmul.f32 1.442695, %v598_v52 }
 0x144   : > { %v1837_v57 = vpop.eup %1369  ;;  %1373 = vpow2.f32 %v607_v55 }
 0x145   : > { %v584_v41 = vpop.xlane.xlu1 %583  ;;  %v1839_v59 = vpop.eup %1371  ;;  %1375 = vpow2.f32 %v611_v56 }
 0x146   : > { %v1821_v42 = vmax.f32 %v1818_v38, %v584_v41 }
 0x148   : > { %v600_v44 = vsub.f32 %v1818_v38, %v1821_v42  ;;  %937 = vst.msk [vmem:[#allocation2 + $0x38] sm:$0xff] %vm321_vm1, %v1821_v42  ;;  %634 = vperm.xlu1 %1362, %v588_v34  }
 0x149   : > { %758 = vperm.xlu0 %1361, %v1823_v43   ;;  %654 = vperm.xlu2 %1360, %v1821_v42  }
 0x14a   : > { %v1843_v60 = vpop.eup %1373 }
 0x14b   : > { %v1845_v63 = vpop.eup %1375 }
 0x150   : > { %748 = vperm.xlu1 %1362, %v1831_v48  }
 0x151   : > { %768 = vperm.xlu0 %1361, %v1833_v50   ;;  %629 = vperm.xlu2 %1360, %v587_v17   ;;  %v1257_v17 = vld [vmem:[%s274_s18 + $0x8] sm:$0xff] }
 0x152   : > { %851 = vmatpush.bf16.msrb.mxu1 %v1257_v17 }
 0x158   : > { %778 = vperm.xlu1 %1362, %v1837_v57  }
 0x159   : > { %753 = vperm.xlu2 %1360, %v1839_v59  }
 0x160   : > { %763 = vperm.xlu1 %1362, %v1843_v60  }
 0x161   : > { %773 = vperm.xlu2 %1360, %v1845_v63  }
 0x193   : > { %v640_v0 = vpop.permute.xlu2 %639 }
 0x194   : > { %v661_v6 = vsub.f32 %v1766_v58, %v640_v0 }
 0x196   : > { %v673_v11 = vmul.f32 1.442695, %v661_v6 }
 0x19b   : > { %v620_v2 = vpop.permute.xlu2 %619 }
 0x19c   : > { %v657_v4 = vsub.f32 %v1753_v53, %v620_v2 }
 0x19e   : > { %v665_v7 = vmul.f32 1.442695, %v657_v4 }
 0x1a0   : > { %1377 = vpow2.f32 %v665_v7 }
 0x1a1   : > { %1379 = vpow2.f32 %v673_v11 }
 0x1a3   : > { %v655_v12 = vpop.permute.xlu2 %654 }
 0x1a4   : > { %v664_v13 = vsub.f32 %v1791_v9, %v655_v12 }
 0x1a6   : > { %v1378_v14 = vpop.eup %1377  ;;  %v679_v15 = vmul.f32 1.442695, %v664_v13 }
 0x1a7   : > { %v697_v16 = vsel %vm560_vm3, %v1378_v14, 0.0  ;;  %v1380_v19 = vpop.eup %1379  ;;  %v794_v39 = vpack.c.bf16 %v1378_v14, %v1378_v14 }
 0x1a8   : > { %698 = vadd.xlane.f32.xlu0 %v697_v16  ;;  %1381 = vpow2.f32 %v679_v15  ;;  %v709_v9 = vsel %vm560_vm3, %v1380_v19, 0.0  ;;  %v798_v41 = vpack.c.bf16 %v1380_v19, %v1380_v19  ;;  %v681_v15 = vld [vmem:[#allocation3] sm:$0xff] }
 0x1a9   : > { %v804_v55 = vunpack.c.l.b16 %v794_v39  ;;  %v685_v19 = vld [vmem:[#allocation3 + $0x20] sm:$0xff] }
 0x1aa   : > { %v650_v53 = vpop.permute.xlu1 %649  ;;  %v860_v0 = vunpack.c.l.b16 %v798_v41  ;;  %v684_v41 = vld [vmem:[#allocation3 + $0x18] sm:$0xff] }
 0x1ab   : > { %v663_v58 = vsub.f32 %v1769_v61, %v650_v53  ;;  %v630_v18 = vpop.permute.xlu2 %629  ;;  %v689_v53 = vmul.f32 %v1831_v48, %v681_v15  ;;  %v683_v48 = vld [vmem:[#allocation3 + $0x10] sm:$0xff] }
 0x1ac   : > { %v659_v20 = vsub.f32 %v1756_v54, %v630_v18 }
 0x1ad   : > { %v677_v21 = vmul.f32 1.442695, %v663_v58 }
 0x1ae   : > { %v669_v22 = vmul.f32 1.442695, %v659_v20  ;;  %v1382_v23 = vpop.eup %1381 }
 0x1af   : > { %1383 = vpow2.f32 %v677_v21  ;;  %v801_v28 = vpack.c.bf16 %v1382_v23, %v1382_v23  ;;  %v718_v33 = vsel %vm560_vm3, %v1382_v23, 0.0  ;;  %v693_v21 = vmul.f32 %v1833_v50, %v685_v19 }
 0x1b0   : > { %1385 = vpow2.f32 %v669_v22  ;;  %710 = vadd.xlane.f32.xlu0 %v709_v9 }
 0x1b1   : > { %v889_v35 = vunpack.c.l.b16 %v801_v28 }
 0x1b2   : > { %v625_v24 = vpop.permute.xlu1 %624 }
 0x1b3   : > { %v645_v25 = vpop.permute.xlu0 %644  ;;  %v658_v26 = vsub.f32 %v1772_v62, %v625_v24  ;;  %v1879_v16 = vpop.permute.xlu2 %753 }
 0x1b4   : > { %v662_v27 = vsub.f32 %v1784_v5, %v645_v25  ;;  %v687_v25 = vld [vmem:[#allocation3 + $0x30] sm:$0xff] }
 0x1b5   : > { %v1384_v61 = vpop.eup %1383  ;;  %v667_v29 = vmul.f32 1.442695, %v658_v26  ;;  %v688_v26 = vld [vmem:[#allocation3 + $0x38] sm:$0xff] }
 0x1b6   : > { %v675_v30 = vmul.f32 1.442695, %v662_v27  ;;  %v1386_v31 = vpop.eup %1385  ;;  %v800_v54 = vpack.c.bf16 %v1384_v61, %v1384_v61  ;;  %v715_v32 = vsel %vm560_vm3, %v1384_v61, 0.0  ;;  %v695_v27 = vmul.f32 %v1837_v57, %v687_v25  ;;  %v686_v57 = vld [vmem:[#allocation3 + $0x28] sm:$0xff] }
 0x1b7   : > { %1387 = vpow2.f32 %v667_v29  ;;  %716 = vadd.xlane.f32.xlu2 %v715_v32  ;;  %v703_v34 = vsel %vm560_vm3, %v1386_v31, 0.0  ;;  %v796_v6 = vpack.c.bf16 %v1386_v31, %v1386_v31  ;;  %v691_v29 = vmul.f32 %v1823_v43, %v683_v48 }
 0x1b8   : > { %v888_v36 = vunpack.c.l.b16 %v800_v54  ;;  %1389 = vpow2.f32 %v675_v30  ;;  %719 = vadd.xlane.f32.xlu0 %v718_v33  ;;  %704 = vadd.xlane.f32.xlu1 %v703_v34 }
 0x1b9   : > { %v832_v11 = vunpack.c.l.b16 %v796_v6 }
 0x1ba   : > { %v635_v62 = vpop.permute.xlu1 %634  ;;  %v890_v5 = vpack.c.b16 %v889_v35, %v888_v36  ;;  %v682_v35 = vld [vmem:[#allocation3 + $0x8] sm:$0xff] }
 0x1bb   : > { %v660_v37 = vsub.f32 %v1781_v3, %v635_v62  ;;  %v615_v3 = vmul.f32 1.442695, %v600_v44  ;;  %v1873_v42 = vpop.permute.xlu0 %758  ;;  %v1883_v20 = vpop.permute.xlu2 %773  ;;  %v690_v36 = vmul.f32 %v1839_v59, %v682_v35  ;;  %v694_v62 = vmul.f32 %v1845_v63, %v686_v57  ;;  %v738_v63 = vld [vmem:[#allocation4] sm:$0xff] }
 0x1bc   : > { %1239 = vmatmul.msk.bf16.vlgmr.msrb.gmra.mxu3 %vm560_vm3, %v890_v5 }
 0x1bd   : > { %v1388_v40 = vpop.eup %1387  ;;  %v671_v45 = vmul.f32 1.442695, %v660_v37 }
 0x1be   : > { %v1390_v46 = vpop.eup %1389  ;;  %v795_v47 = vpack.c.bf16 %v1388_v40, %v1388_v40  ;;  %v700_v49 = vsel %vm560_vm3, %v1388_v40, 0.0 }
 0x1bf   : > { %v799_v51 = vpack.c.bf16 %v1390_v46, %v1390_v46  ;;  %1391 = vpow2.f32 %v671_v45  ;;  %701 = vadd.xlane.f32.xlu2 %v700_v49  ;;  %v712_v52 = vsel %vm560_vm3, %v1390_v46, 0.0  ;;  %v692_v46 = vmul.f32 %v1843_v60, %v684_v41  ;;  %v744_v49 = vld [vmem:[#allocation4 + $0x30] sm:$0xff] }
 0x1c0   : > { %v805_v56 = vunpack.c.l.b16 %v795_v47  ;;  %713 = vadd.xlane.f32.xlu1 %v712_v52  ;;  %1393 = vpow2.f32 %v615_v3 }
 0x1c1   : > { %v861_v1 = vunpack.c.l.b16 %v799_v51 }
 0x1c2   : > { %v806_v2 = vpack.c.b16 %v805_v56, %v804_v55  ;;  %v1875_v44 = vpop.permute.xlu1 %748 }
 0x1c3   : > { %v862_v4 = vpack.c.b16 %v861_v1, %v860_v0  ;;  %v1877_v14 = vpop.permute.xlu0 %768  ;;  %v786_v0 = vmul.f32 %v1875_v44, %v738_v63 }
 0x1c4   : > { %1224 = vmatmul.msk.bf16.vlgmr.msrb.gmra.mxu0 %vm560_vm3, %v806_v2 }
 0x1c5   : > { %v1392_v7 = vpop.eup %1391  ;;  %1234 = vmatmul.msk.bf16.vlgmr.msrb.gmra.mxu2 %vm560_vm3, %v862_v4 }
 0x1c6   : > { %v797_v8 = vpack.c.bf16 %v1392_v7, %v1392_v7  ;;  %v706_v10 = vsel %vm560_vm3, %v1392_v7, 0.0  ;;  %v1394_v38 = vpop.eup %1393  ;;  %v745_v7 = vld [vmem:[#allocation4 + $0x38] sm:$0xff] }
 0x1c7   : > { %707 = vadd.xlane.f32.xlu2 %v706_v10  ;;  %v696_v61 = vmul.f32 %v1394_v38, %v688_v26 }
 0x1c8   : > { %v833_v12 = vunpack.c.l.b16 %v797_v8 }
 0x1ca   : > { %v834_v13 = vpack.c.b16 %v833_v12, %v832_v11  ;;  %v779_v17 = vpop.permute.xlu1 %778  ;;  %v742_v11 = vld [vmem:[#allocation4 + $0x20] sm:$0xff] }
 0x1cb   : > { %v792_v56 = vmul.f32 %v779_v17, %v744_v49  ;;  %v790_v15 = vmul.f32 %v1877_v14, %v742_v11  ;;  %v743_v14 = vld [vmem:[#allocation4 + $0x28] sm:$0xff] }
 0x1cc   : > { %1229 = vmatmul.msk.bf16.vlgmr.msrb.gmra.mxu1 %vm560_vm3, %v834_v13  ;;  %783 = vperm.xlu0 %1361, %v1394_v38   ;;  %v739_v13 = vld [vmem:[#allocation4 + $0x8] sm:$0xff]  ;;  %v740_v38 = vld [vmem:[#allocation4 + $0x10] sm:$0xff] }
 0x1d2   : > { %v1886_v22 = vpop.permute.xlu1 %763 }
 0x21b   : > { %v699_v58 = vpop.xlane.xlu0 %698 }
 0x21c   : > { %v721_v18 = vadd.f32 %v699_v58, %v689_v53  ;;  %v787_v53 = vmul.f32 %v1879_v16, %v739_v13  ;;  %v788_v58 = vmul.f32 %v1873_v42, %v740_v38  ;;  %v741_v42 = vld [vmem:[#allocation4 + $0x18] sm:$0xff]  ;;  %v791_v16 = vmul.f32 %v1883_v20, %v743_v14 }
 0x21e   : > { %730 = vst.msk [vmem:[#allocation3] sm:$0xff] %vm321_vm1, %v721_v18 }
 0x223   : > { %v711_v9 = vpop.xlane.xlu0 %710 }
 0x224   : > { %v725_v23 = vadd.f32 %v711_v9, %v693_v21 }
 0x225   : > { %v941_v24 = vld [vmem:[#allocation3] sm:$0xff] }
 0x226   : > { %734 = vst.msk [vmem:[#allocation3 + $0x20] sm:$0xff] %vm321_vm1, %v725_v23  ;;  %1395 = vrcp.f32 %v941_v24 }
 0x22a   : > { %v717_v28 = vpop.xlane.xlu2 %716 }
 0x22b   : > { %v727_v30 = vadd.f32 %v717_v28, %v695_v27  ;;  %v720_v31 = vpop.xlane.xlu0 %719  ;;  %v705_v50 = vpop.xlane.xlu1 %704  ;;  %v789_v28 = vmul.f32 %v1886_v22, %v741_v42 }
 0x22c   : > { %v1396_v54 = vpop.eup %1395  ;;  %v728_v32 = vadd.f32 %v720_v31, %v696_v61  ;;  %v723_v33 = vadd.f32 %v705_v50, %v691_v29 }
 0x22d   : > { %736 = vst.msk [vmem:[#allocation3 + $0x30] sm:$0xff] %vm321_vm1, %v727_v30  ;;  %967 = vperm.xlu2 %1360, %v1396_v54   ;;  %v945_v34 = vld [vmem:[#allocation3 + $0x20] sm:$0xff] }
 0x22e   : > { %737 = vst.msk [vmem:[#allocation3 + $0x38] sm:$0xff] %vm321_vm1, %v728_v32  ;;  %1397 = vrcp.f32 %v945_v34 }
 0x22f   : > { %732 = vst.msk [vmem:[#allocation3 + $0x10] sm:$0xff] %vm321_vm1, %v723_v33 }
 0x232   : > { %v702_v43 = vpop.xlane.xlu2 %701 }
 0x233   : > { %v722_v5 = vadd.f32 %v702_v43, %v690_v36  ;;  %v714_v37 = vpop.xlane.xlu1 %713 }
 0x234   : > { %v1398_v39 = vpop.eup %1397  ;;  %v726_v40 = vadd.f32 %v714_v37, %v694_v62  ;;  %v947_v48 = vld [vmem:[#allocation3 + $0x30] sm:$0xff] }
 0x235   : > { %731 = vst.msk [vmem:[#allocation3 + $0x8] sm:$0xff] %vm321_vm1, %v722_v5  ;;  %987 = vperm.xlu1 %1362, %v1398_v39   ;;  %v948_v4 = vld [vmem:[#allocation3 + $0x38] sm:$0xff] }
 0x236   : > { %735 = vst.msk [vmem:[#allocation3 + $0x28] sm:$0xff] %vm321_vm1, %v726_v40  ;;  %v943_v45 = vld [vmem:[#allocation3 + $0x10] sm:$0xff] }
 0x237   : > { %1399 = vrcp.f32 %v943_v45 }
 0x23a   : > { %v708_v47 = vpop.xlane.xlu2 %707 }
 0x23b   : > { %v724_v59 = vadd.f32 %v708_v47, %v692_v46 }
 0x23c   : > { %v942_v51 = vld [vmem:[#allocation3 + $0x8] sm:$0xff] }
 0x23d   : > { %v1400_v52 = vpop.eup %1399  ;;  %733 = vst.msk [vmem:[#allocation3 + $0x18] sm:$0xff] %vm321_vm1, %v724_v59  ;;  %1401 = vrcp.f32 %v942_v51  ;;  %v946_v55 = vld [vmem:[#allocation3 + $0x28] sm:$0xff] }
 0x23e   : > { %977 = vperm.xlu0 %1361, %v1400_v52   ;;  %1403 = vrcp.f32 %v946_v55  ;;  %v784_v8 = vpop.permute.xlu0 %783 }
 0x23f   : > { %v909_v3 = vpop.f32.mrf.mxu3  ;;  %1405 = vrcp.f32 %v948_v4  ;;  %v793_v44 = vmul.f32 %v784_v8, %v745_v7 }
 0x240   : > { %v920_v1 = vadd.f32 %v909_v3, %v792_v56 }
 0x241   : > { %v825_v2 = vpop.f32.mrf.mxu0 }
 0x242   : > { %928 = vst.msk [vmem:[#allocation4 + $0x30] sm:$0xff] %vm338_vm0, %v920_v1  ;;  %v914_v60 = vadd.f32 %v825_v2, %v786_v0 }
 0x243   : > { %v1402_v6 = vpop.eup %1401 }
 0x244   : > { %v1404_v10 = vpop.eup %1403  ;;  %922 = vst.msk [vmem:[#allocation4] sm:$0xff] %vm338_vm0, %v914_v60  ;;  %972 = vperm.xlu1 %1362, %v1402_v6   ;;  %v944_v12 = vld [vmem:[#allocation3 + $0x18] sm:$0xff] }
 0x245   : > { %1407 = vrcp.f32 %v944_v12  ;;  %v1406_v24 = vpop.eup %1405 }
 0x246   : > { %992 = vperm.xlu0 %1361, %v1404_v10   ;;  %1409 = vrcp.f32 %v947_v48 }
 0x247   : > { %v911_v17 = vpop.f32.mrf.mxu3 }
 0x248   : > { %v921_v18 = vadd.f32 %v911_v17, %v793_v44  ;;  %v881_v19 = vpop.f32.mrf.mxu2 }
 0x249   : > { %v827_v21 = vpop.f32.mrf.mxu0  ;;  %v853_v9 = vpop.f32.mrf.mxu1  ;;  %v918_v23 = vadd.f32 %v881_v19, %v790_v15  ;;  %v963_v43 = vld [vmem:[#allocation4 + $0x30] sm:$0xff] }
 0x24a   : > { %929 = vst.msk [vmem:[#allocation4 + $0x38] sm:$0xff] %vm338_vm0, %v921_v18  ;;  %v915_v25 = vadd.f32 %v827_v21, %v787_v53  ;;  %v916_v26 = vadd.f32 %v853_v9, %v788_v58 }
 0x24b   : > { %v1408_v27 = vpop.eup %1407  ;;  %926 = vst.msk [vmem:[#allocation4 + $0x20] sm:$0xff] %vm338_vm0, %v918_v23  ;;  %v957_v54 = vld [vmem:[#allocation4] sm:$0xff] }
 0x24c   : > { %923 = vst.msk [vmem:[#allocation4 + $0x8] sm:$0xff] %vm338_vm0, %v915_v25  ;;  %1002 = vperm.xlu1 %1362, %v1406_v24   ;;  %982 = vperm.xlu2 %1360, %v1408_v27   ;;  %v1410_v50 = vpop.eup %1409 }
 0x24d   : > { %924 = vst.msk [vmem:[#allocation4 + $0x10] sm:$0xff] %vm338_vm0, %v916_v26 }
 0x250   : > { %v883_v61 = vpop.f32.mrf.mxu2 }
 0x251   : > { %v855_v29 = vpop.f32.mrf.mxu1  ;;  %v919_v30 = vadd.f32 %v883_v61, %v791_v16  ;;  %v964_v51 = vld [vmem:[#allocation4 + $0x38] sm:$0xff] }
 0x252   : > { %v917_v31 = vadd.f32 %v855_v29, %v789_v28  ;;  %v961_v35 = vld [vmem:[#allocation4 + $0x20] sm:$0xff] }
 0x253   : > { %927 = vst.msk [vmem:[#allocation4 + $0x28] sm:$0xff] %vm338_vm0, %v919_v30  ;;  %v958_v41 = vld [vmem:[#allocation4 + $0x8] sm:$0xff] }
 0x254   : > { %925 = vst.msk [vmem:[#allocation4 + $0x18] sm:$0xff] %vm338_vm0, %v917_v31  ;;  %997 = vperm.xlu2 %1360, %v1410_v50   ;;  %v959_v37 = vld [vmem:[#allocation4 + $0x10] sm:$0xff] }
 0x25a   : > { %v962_v47 = vld [vmem:[#allocation4 + $0x28] sm:$0xff] }
 0x25b   : > { %v960_v20 = vld [vmem:[#allocation4 + $0x18] sm:$0xff] }
 0x287   : > { %v968_v32 = vpop.permute.xlu2 %967 }
 0x288   : > { %v1005_v33 = vmul.f32 %v968_v32, %v957_v54 }
 0x28a   : > { %1013 = vst.msk [vmem:[%s1915_s29] sm:$0xff] %vm338_vm0, %v1005_v33 }
 0x2a6   : > { %v983_v22 = vpop.permute.xlu2 %982 }
 0x2a7   : > { %v1008_v34 = vmul.f32 %v983_v22, %v960_v20  ;;  %v988_v57 = vpop.permute.xlu1 %987 }
 0x2a8   : > { %v1009_v36 = vmul.f32 %v988_v57, %v961_v35 }
 0x2a9   : > { %1016 = vst.msk [vmem:[%s1915_s29 + $0x18] sm:$0xff] %vm338_vm0, %v1008_v34 }
 0x2aa   : > { %1017 = vst.msk [vmem:[%s1915_s29 + $0x20] sm:$0xff] %vm338_vm0, %v1009_v36 }
 0x2ae   : > { %v998_v62 = vpop.permute.xlu2 %997 }
 0x2af   : > { %v1011_v5 = vmul.f32 %v998_v62, %v963_v43 }
 0x2b0   : > { %v978_v39 = vpop.permute.xlu0 %977 }
 0x2b1   : > { %1019 = vst.msk [vmem:[%s1915_s29 + $0x30] sm:$0xff] %vm338_vm0, %v1011_v5  ;;  %v1007_v40 = vmul.f32 %v978_v39, %v959_v37 }
 0x2b3   : > { %1015 = vst.msk [vmem:[%s1915_s29 + $0x10] sm:$0xff] %vm338_vm0, %v1007_v40 }
 0x2b6   : > { %v973_v45 = vpop.permute.xlu1 %972 }
 0x2b7   : > { %v1006_v46 = vmul.f32 %v973_v45, %v958_v41 }
 0x2b8   : > { %v993_v49 = vpop.permute.xlu0 %992 }
 0x2b9   : > { %1014 = vst.msk [vmem:[%s1915_s29 + $0x8] sm:$0xff] %vm338_vm0, %v1006_v46  ;;  %v1010_v59 = vmul.f32 %v993_v49, %v962_v47 }
 0x2bb   : > { %1018 = vst.msk [vmem:[%s1915_s29 + $0x28] sm:$0xff] %vm338_vm0, %v1010_v59 }
 0x2be   : > { %v1003_v52 = vpop.permute.xlu1 %1002 }
 0x2bf   : > { %v1012_v63 = vmul.f32 %v1003_v52, %v964_v51 }
 0x2c1   : > { %1020 = vst.msk [vmem:[%s1915_s29 + $0x38] sm:$0xff] %vm338_vm0, %v1012_v63 }
 0x2c2   : > { %1528 = shalt.err (!%p1525_p13)
}
 0x2c3   : > { %s1594_s1 = smov 128   ;;  %s1595_s20 = smov 8  }
 0x2c4   : > { %1287 = dma.vmem_to_hbm [thread:$0]  (%p1671_p9), %s1038_s22, 1024, %s1040_s23, %s1022_s15, %s1594_s1, %s1594_s1, %s1595_s20  }
 0x2c5 PF: > { %s1994_s28 = sld [smem:[#allocation17_spill]]  ;;  %s1054_s16 = sand.u32 1, %s1567_s12  }
 0x2c6   : > { %p1300_p0 = pnand %p1182_p12, %p1678_p11  ;;  %s1055_s14 = scalar_lea.sflag [#allocation7], %s1054_s16 }
 0x2c8   : > { %p1301_p1 = pneg %p1300_p0 }
 0x2ca   : > { %1562 = dma.done.wait (%p1301_p1), %s1055_s14, 1024  }
 0x2cb   : > { %1564 = vsyncadd (%p1301_p1), %s1055_s14, 4294966272  ;;  %s22_s17 = sadd.s32 1, %s1994_s28   ;;  %s1995_s26 = sld [smem:[#allocation15_spill]] }
 0x2cc   : > { %p19_p2 = scmp.ge.s32.totalorder %s22_s17, 4   ;;  %s1996_s14 = sld [smem:[#allocation19_spill]] }
 0x2cd   : > { %s1997_s15 = sld [smem:[#allocation16_spill]]  ;;  %s1999_s12 = smov %s1571_s13 }
 0x2ce   : > { %s1998_s16 = sld [smem:[#allocation18_spill]]  ;;  %21 = sbr.rel (!%p19_p2) target bundleno = 10 (0xa), region = 117 }
 0x2d1   : > { %s2000_s13 = smov %s1995_s26 }
 0x2d3   :  { %1061 = vsyncpa [#allocation6], 1 }
 0x2d4   :  { %1063 = vsyncpa [#allocation6 + $0x1], 1 }
 0x2d5   :  { %1064 = vsyncpa [#allocation9], 1 }
 0x2d6   :  { %1066 = vsyncpa [#allocation9 + $0x1], 1 }
 0x2d7   :  { %1067 = vsyncpa [#allocation7], 1 }
 0x2d8   :  { %1069 = vsyncpa [#allocation7 + $0x1], 1 }

</bundles_post_ra>
